<compile_context>
chip_gen: v7x
topology: tpu7x:2x2x1
jax: 0.10.0
libtpu: 0.0.40
codegen_flags: <defaults>
</compile_context>

<pallas_src>
import numpy as np
import jax
import jax.numpy as jnp
from jax.experimental import pallas as pl
from jax.experimental.pallas import tpu as pltpu


_LANE = 128
_SUBLANE = 8
# ~4 slab-sized f32 live buffers per grid step: 2x double-buffered v input block
# plus the `att` / `masked` elementwise temporaries the argmax materializes.
_SLAB_LIVE_COPIES = 4
_VMEM_BUDGET_BYTES = 20 * 1024 * 1024   # conservative; fits v5e/v6e/v7x scoped VMEM
_VMEM_LIMIT_BYTES = 32 * 1024 * 1024    # <= physical VMEM on all generations


def _round_up(x, m):
    return ((x + m - 1) // m) * m


def _pick_batch_block(B, HW):
    """VMEM-sized batch block: multiple of 8, >=2 grid steps once B is large."""
    if B <= _SUBLANE:
        return B                                   # tiny batch: single block
    hw_pad = _round_up(HW, _LANE)                  # lane-padded slab width
    bytes_per_row = _SLAB_LIVE_COPIES * hw_pad * 4
    max_bb_vmem = max(_SUBLANE, _VMEM_BUDGET_BYTES // bytes_per_row)
    bb = min(B, max_bb_vmem)
    if B >= 2 * _SUBLANE:
        bb = min(bb, -(-B // 2))                   # >=2 steps -> both v7x TCs
    return max(_SUBLANE, (bb // _SUBLANE) * _SUBLANE)


def _make_actor_kernel(BB, HW, coord_scale, no_attention):
    """Batch-vectorized gaussian-attention + argmax over a (BB, HW) slab."""
    assert HW < (1 << 24), "flat index must be exactly representable in f32"
    sentinel = float(HW)   # larger than any valid flat index

    def kernel(pos_ref, coords_ref, v_ref, out_ref):
        # pos_ref   : VMEM (BB, 2)  int32  (x, y) attention centers
        # coords_ref: VMEM (2, HW)  f32    pre-scaled (col*s, row*s); resident
        # v_ref     : VMEM (BB, HW) f32    flattened value images (lane-dense)
        # out_ref   : VMEM (BB, 1)  int32  flat row-major argmax index
        v = v_ref[...]                                                # (BB, HW)

        if no_attention:
            att = v
        else:
            # sigma scale is folded into coord_scale -> no full-slab '* inv' op.
            cx = pos_ref[:, 0:1].astype(jnp.float32) * coord_scale    # (BB, 1)
            cy = pos_ref[:, 1:2].astype(jnp.float32) * coord_scale    # (BB, 1)
            dx = coords_ref[0:1, :] - cx                              # (BB, HW)
            dy = coords_ref[1:2, :] - cy                              # (BB, HW)
            att = v * jnp.exp(-(dx * dx + dy * dy))

        # First-occurrence row-major argmax per batch row:
        # single lane-axis max, then masked-min of the flat index.
        max_v = jnp.max(att, axis=1, keepdims=True)                   # (BB, 1)
        flat_f = jax.lax.broadcasted_iota(jnp.int32, (1, HW), 1).astype(jnp.float32)
        masked = jnp.where(att == max_v, flat_f, sentinel)            # (BB, HW)
        out_ref[...] = jnp.min(masked, axis=1, keepdims=True).astype(jnp.int32)

    return kernel


def actor_forward(v_image, pos_coords, sigma=3.0, no_attention=False):
    """Pallas implementation of ActorModel.forward.

    v_image   : [B, 1, H, W] float32 (NCHW)
    pos_coords: [B, 2] int32, (x, y) attention centers in pixel coordinates
    returns   : [B, 2] int32 pixel_pos, columns (x, y)
    """
    B, C, H, W = v_image.shape
    assert C == 1, "value image is single-channel"
    HW = H * W

    # Lane-dense, contiguous reshape in the wrapper (free in HBM).
    v = v_image[:, 0].reshape(B, HW).astype(jnp.float32)     # [B, H*W]
    pos = pos_coords.astype(jnp.int32)                       # [B, 2]

    BB = _pick_batch_block(B, HW)
    B_pad = _round_up(B, BB)
    if B_pad != B:
        # Padded rows produce a valid (discarded) argmax; outputs sliced below.
        v = jnp.pad(v, ((0, B_pad - B), (0, 0)))
        pos = jnp.pad(pos, ((0, B_pad - B), (0, 0)))

    # Pre-scaled coordinate table: exact integer math in numpy, baked constant,
    # resident in VMEM across all grid steps (constant block index).
    s = 1.0 if no_attention else 1.0 / (float(sigma) * float(np.sqrt(2.0)))
    idx = np.arange(HW, dtype=np.int64)
    coords = jnp.asarray(
        np.stack([(idx % W).astype(np.float32) * s,
                  (idx // W).astype(np.float32) * s], axis=0))   # (2, HW) f32

    kernel = _make_actor_kernel(BB, HW, s, no_attention)
    grid = (B_pad // BB,)

    flat = pl.pallas_call(
        kernel,
        grid_spec=pltpu.PrefetchScalarGridSpec(
            num_scalar_prefetch=0,
            grid=grid,
            in_specs=[
                pl.BlockSpec((BB, 2), lambda i: (i, 0)),    # attention centers
                pl.BlockSpec((2, HW), lambda i: (0, 0)),    # coord table (resident)
                pl.BlockSpec((BB, HW), lambda i: (i, 0)),   # flattened value maps
            ],
            out_specs=pl.BlockSpec((BB, 1), lambda i: (i, 0)),
        ),
        out_shape=jax.ShapeDtypeStruct((B_pad, 1), jnp.int32),
        compiler_params=pltpu.CompilerParams(
            dimension_semantics=("parallel",),   # each step owns its output block
            vmem_limit_bytes=_VMEM_LIMIT_BYTES,
        ),
    )(pos, coords, v)

    # Decode flat index -> (x, y) on the tiny output in plain XLA.
    flat = flat[:B, 0]
    return jnp.stack([flat % W, flat // W], axis=1).astype(jnp.int32)


def _reference(v_image, pos_coords, sigma, no_attention):
    """Pure-JAX reference of the same forward path."""
    B, _, H, W = v_image.shape
    v = v_image[:, 0].astype(jnp.float32)
    if no_attention:
        att = v
    else:
        inv = 1.0 / (2.0 * float(sigma) * float(sigma))
        xx = jnp.arange(W, dtype=jnp.float32)[None, None, :]
        yy = jnp.arange(H, dtype=jnp.float32)[None, :, None]
        cx = pos_coords[:, 0].astype(jnp.float32)[:, None, None]
        cy = pos_coords[:, 1].astype(jnp.float32)[:, None, None]
        att = v * jnp.exp(-((xx - cx) ** 2 + (yy - cy) ** 2) * inv)
    flat = jnp.argmax(att.reshape(B, -1), axis=1)
    return jnp.stack([flat % W, flat // W], axis=1).astype(jnp.int32)


def _check(v_image, pos_coords, sigma, no_attention):
    H, W = v_image.shape[-2:]
    pp = np.asarray(jax.block_until_ready(
        actor_forward(v_image, pos_coords, sigma=sigma, no_attention=no_attention)))
    ref = np.asarray(_reference(v_image, pos_coords, sigma, no_attention))
    # the asserts from ActorModel.forward
    assert (pp[:, 1] >= 0).all() and (pp[:, 1] < H).all()
    assert (pp[:, 0] >= 0).all() and (pp[:, 0] < W).all()
    np.testing.assert_array_equal(pp, ref)


if __name__ == "__main__":
    sigma = 3.0

    # Small case (B=2): single block, grid=(1,) — gaussian and no-attention paths.
    B, C, H, W = 2, 1, 16, 16
    key = jax.random.PRNGKey(0)
    k1, k2, k3, k4 = jax.random.split(key, 4)
    v_image = jax.random.normal(k1, (B, C, H, W), dtype=jnp.float32)
    pos_coords = jax.random.randint(k2, (B, 2), 0, min(H, W)).astype(jnp.int32)
    _check(v_image, pos_coords, sigma, no_attention=False)
    _check(v_image, pos_coords, sigma, no_attention=True)

    # Larger batch (B=20): exercises batch padding + multi-step parallel grid.
    B2 = 20
    v_image2 = jax.random.normal(k3, (B2, C, H, W), dtype=jnp.float32)
    pos_coords2 = jax.random.randint(k4, (B2, 2), 0, min(H, W)).astype(jnp.int32)
    _check(v_image2, pos_coords2, sigma, no_attention=False)

    print("KERNEL_OK")
</pallas_src>

<mosaic_0001>
module attributes {stable_mosaic.version = 11 : i64} {
  func.func @kernel(%arg0: i32, %arg1: memref<2x2xi32, #tpu.memory_space<vmem>>, %arg2: memref<2x256xf32, #tpu.memory_space<vmem>>, %arg3: memref<2x256xf32, #tpu.memory_space<vmem>>, %arg4: memref<2x1xi32, #tpu.memory_space<vmem>>) attributes {dimension_semantics = [#tpu.dimension_semantics<parallel>], iteration_bounds = array<i64: 1>, scalar_prefetch = 0 : i64, scratch_operands = 0 : i64, tpu.core_type = #tpu.core_type<tc>, window_params = [{transform_indices = @transform_0, window_bounds = array<i64: 2, 2>}, {pipeline_mode = #tpu.pipeline_mode<synchronous>, transform_indices = @transform_1, window_bounds = array<i64: 2, 256>}, {transform_indices = @transform_2, window_bounds = array<i64: 2, 256>}, {transform_indices = @transform_3, window_bounds = array<i64: 2, 1>}]} {
    %c0 = arith.constant 0 : index
    %c0_0 = arith.constant 0 : index
    %0 = vector.load %arg3[%c0, %c0_0] : memref<2x256xf32, #tpu.memory_space<vmem>>, vector<2x256xf32>
    %c0_1 = arith.constant 0 : index
    %c0_2 = arith.constant 0 : index
    %1 = vector.load %arg1[%c0_1, %c0_2] : memref<2x2xi32, #tpu.memory_space<vmem>>, vector<2x1xi32>
    %2 = arith.sitofp %1 : vector<2x1xi32> to vector<2x1xf32>
    %cst = arith.constant 0.235702261 : f32
    %3 = vector.broadcast %cst : f32 to vector<2x1xf32>
    %4 = arith.mulf %2, %3 : vector<2x1xf32>
    %c0_3 = arith.constant 0 : index
    %c1 = arith.constant 1 : index
    %5 = vector.load %arg1[%c0_3, %c1] : memref<2x2xi32, #tpu.memory_space<vmem>>, vector<2x1xi32>
    %6 = arith.sitofp %5 : vector<2x1xi32> to vector<2x1xf32>
    %cst_4 = arith.constant 0.235702261 : f32
    %7 = vector.broadcast %cst_4 : f32 to vector<2x1xf32>
    %8 = arith.mulf %6, %7 : vector<2x1xf32>
    %c0_5 = arith.constant 0 : index
    %c0_6 = arith.constant 0 : index
    %9 = vector.load %arg2[%c0_5, %c0_6] : memref<2x256xf32, #tpu.memory_space<vmem>>, vector<1x256xf32>
    %10 = vector.broadcast %9 : vector<1x256xf32> to vector<2x256xf32>
    %11 = vector.broadcast %4 : vector<2x1xf32> to vector<2x256xf32>
    %12 = arith.subf %10, %11 : vector<2x256xf32>
    %c1_7 = arith.constant 1 : index
    %c0_8 = arith.constant 0 : index
    %13 = vector.load %arg2[%c1_7, %c0_8] : memref<2x256xf32, #tpu.memory_space<vmem>>, vector<1x256xf32>
    %14 = vector.broadcast %13 : vector<1x256xf32> to vector<2x256xf32>
    %15 = vector.broadcast %8 : vector<2x1xf32> to vector<2x256xf32>
    %16 = arith.subf %14, %15 : vector<2x256xf32>
    %17 = arith.mulf %12, %12 : vector<2x256xf32>
    %18 = arith.mulf %16, %16 : vector<2x256xf32>
    %19 = arith.addf %17, %18 : vector<2x256xf32>
    %cst_9 = arith.constant 0.000000e+00 : f32
    %20 = vector.broadcast %cst_9 : f32 to vector<2x256xf32>
    %21 = arith.subf %20, %19 : vector<2x256xf32>
    %22 = math.exp %21 : vector<2x256xf32>
    %23 = arith.mulf %0, %22 : vector<2x256xf32>
    %cst_10 = arith.constant dense<0xFF800000> : vector<2xf32>
    %24 = vector.multi_reduction <maximumf>, %23, %cst_10 [1] : vector<2x256xf32> to vector<2xf32>
    %25 = vector.shape_cast %24 : vector<2xf32> to vector<2x1xf32>
    %26 = tpu.iota {dimensions = array<i32: 1>} : vector<1x256xi32>
    %27 = arith.sitofp %26 : vector<1x256xi32> to vector<1x256xf32>
    %28 = vector.broadcast %25 : vector<2x1xf32> to vector<2x256xf32>
    %29 = arith.cmpf oeq, %23, %28 : vector<2x256xf32>
    %cst_11 = arith.constant 2.560000e+02 : f32
    %30 = vector.shape_cast %27 : vector<1x256xf32> to vector<1x256xf32>
    %31 = vector.broadcast %30 : vector<1x256xf32> to vector<2x256xf32>
    %32 = vector.broadcast %cst_11 : f32 to vector<2x256xf32>
    %33 = arith.select %29, %31, %32 : vector<2x256xi1>, vector<2x256xf32>
    %cst_12 = arith.constant dense<0x7F800000> : vector<2xf32>
    %34 = vector.multi_reduction <minimumf>, %33, %cst_12 [1] : vector<2x256xf32> to vector<2xf32>
    %35 = vector.shape_cast %34 : vector<2xf32> to vector<2x1xf32>
    %36 = arith.fptosi %35 : vector<2x1xf32> to vector<2x1xi32>
    %c0_13 = arith.constant 0 : index
    %c0_14 = arith.constant 0 : index
    %37 = vector.load %arg4[%c0_13, %c0_14] : memref<2x1xi32, #tpu.memory_space<vmem>>, vector<2x1xi32>
    tpu.vector_store %arg4[%c0_13, %c0_14], %36 {strides = array<i32>} : memref<2x1xi32, #tpu.memory_space<vmem>>, vector<2x1xi32>,
    return
  }
  func.func @transform_0(%arg0: i32) -> (i32, i32) {
    %c0_i32 = arith.constant 0 : i32
    %c0_i32_0 = arith.constant 0 : i32
    return %arg0, %c0_i32 : i32, i32
  }
  func.func @transform_1(%arg0: i32) -> (i32, i32) {
    %c0_i32 = arith.constant 0 : i32
    %c0_i32_0 = arith.constant 0 : i32
    %c0_i32_1 = arith.constant 0 : i32
    return %c0_i32, %c0_i32_0 : i32, i32
  }
  func.func @transform_2(%arg0: i32) -> (i32, i32) {
    %c0_i32 = arith.constant 0 : i32
    %c0_i32_0 = arith.constant 0 : i32
    return %arg0, %c0_i32 : i32, i32
  }
  func.func @transform_3(%arg0: i32) -> (i32, i32) {
    %c0_i32 = arith.constant 0 : i32
    %c0_i32_0 = arith.constant 0 : i32
    return %arg0, %c0_i32 : i32, i32
  }
}

</mosaic_0001>

<bundles_post_ra>
// kernel: tpu_custom_call.1
= control target key start
LH: loop header
LB: loop body
LE: loop exit
PB: predicated region body
PF: predicated region fallthrough
CT: control target
= control target key end

     0   :  { %8 = vsyncpa [#allocation3], 0  ;;  %s295_s0 = inlined_call_operand.hbm [shape: s32[2,2], index: 0, kind: input, shape index: {}]   ;;  %s296_s1 = inlined_call_operand.hbm [shape: f32[2,256], index: 1, kind: input, shape index: {}]   ;;  %s297_s2 = inlined_call_operand.vmem [shape: f32[2,256], index: 2, kind: input, shape index: {}]   ;;  %s298_s3 = inlined_call_operand.vmem [shape: s32[2,1], index: 3, kind: output, shape index: {}]  }
   0x1   :  { %9 = vsyncpa [#allocation5], 0  ;;  %s235_s12 = smov [#allocation2]   ;;  %s236_s14 = smov [#allocation4]  }
   0x2   :  { %s16_s13 = sshll.u32 %s235_s12, 4  ;;  %s26_s15 = sshll.u32 %s236_s14, 4  ;;  %s17_s13 = int_to_ptr.vmem [resolvable:$true] %s16_s13  ;;  %s27_s15 = int_to_ptr.vmem [resolvable:$true] %s26_s15 }
   0x3   :  { %s187_s18 = scalar_lea.hbm %s295_s0, 32 }
   0x4   :  { %p188_p0 = scmp.ne.s32.totalorder %s295_s0, %s187_s18  ;;  %p191_p1 = scmp.lt.u32.totalorder %s187_s18, %s295_s0 }
   0x6   :  { %p193_p2 = pnand %p191_p1, %p188_p0 }
   0x8   :  { %196 = shalt.err (!%p193_p2)
}
   0x9   :  { %s197_s23 = scalar_lea.vmem %s17_s13, 32  ;;  %p202_p4 = scmp.lt.s32.totalorder %s17_s13, %s17_s13 }
   0xa   :  { %p198_p3 = scmp.ne.s32.totalorder %s17_s13, %s197_s23  ;;  %p203_p5 = scmp.lt.s32.totalorder %s197_s23, %s197_s23 }
   0xc   :  { %p204_p6 = por %p203_p5, %p202_p4 }
   0xe   :  { %p205_p7 = pnand %p204_p6, %p198_p3 }
  0x10   :  { %208 = shalt.err (!%p205_p7)
}
  0x11   :  { %19 = dma.hbm_to_vmem [thread:$0]  %s295_s0, 32, %s17_s13, [#allocation3]  }
  0x12   :  { %s209_s28 = scalar_lea.hbm %s296_s1, 64 }
  0x13   :  { %p210_p8 = scmp.ne.s32.totalorder %s296_s1, %s209_s28  ;;  %p213_p9 = scmp.lt.u32.totalorder %s209_s28, %s296_s1 }
  0x15   :  { %p215_p10 = pnand %p213_p9, %p210_p8 }
  0x17   :  { %218 = shalt.err (!%p215_p10)
}
  0x18   :  { %s219_s6 = scalar_lea.vmem %s27_s15, 64  ;;  %p224_p12 = scmp.lt.s32.totalorder %s27_s15, %s27_s15 }
  0x19   :  { %p220_p11 = scmp.ne.s32.totalorder %s27_s15, %s219_s6  ;;  %p225_p13 = scmp.lt.s32.totalorder %s219_s6, %s219_s6 }
  0x1b   :  { %p226_p0 = por %p225_p13, %p224_p12 }
  0x1d   :  { %p227_p1 = pnand %p226_p0, %p220_p11 }
  0x1f   :  { %230 = shalt.err (!%p227_p1)
}
  0x20   :  { %29 = dma.hbm_to_vmem [thread:$0]  %s296_s1, 64, %s27_s15, [#allocation5]  }
  0x21   :  { %231 = dma.done.wait [#allocation3], 32  }
  0x22   :  { %232 = vsyncadd [#allocation3], 4294967264 }
  0x23   :  { %233 = dma.done.wait [#allocation5], 64  }
  0x24   :  { %234 = vsyncadd [#allocation5], 4294967232  ;;  %v237_v0 = vmov 0   ;;  %v39_v1 = vld [vmem:[#allocation2] sm:$0x3]  ;;  %v238_v4 = vmov 1   ;;  %v44_v5 = vlaneseq }
  0x25   :  { %181 = vset.pattern.permute.xlu0 %v237_v0  ;;  %v40_v2 = vcvt.s32.f32 %v39_v1  ;;  %v42_v9 = vld [vmem:[#allocation4] ss:$2 sm:$0x3]  ;;  %v62_v10 = vld [vmem:[#allocation4 + $0x1] ss:$2 sm:$0x3] }
  0x26   :  { %v45_v6 = vshrl.u32 %v44_v5, 7  ;;  %v239_v31 = vmov 1983009808   ;;  %v38_v38 = vld [vmem:[%s297_s2] sm:$0xf]  ;;  %vm115_vm0 = vcmask 1041408  }
  0x27   :  { %v41_v3 = vmul.f32 0.23570226, %v40_v2  ;;  %v96_v32 = vunpack.c.l.s4 %v239_v31  ;;  %v122_v46 = vand.u32 127, %v44_v5  ;;  %v240_v48 = vmov 269488144  }
  0x28   :  { %v46_v7 = vsub.s32 0, %v45_v6  ;;  %v50_v8 = vsub.s32 1, %v45_v6  ;;  %v128_v49 = vunpack.c.l.s4 %v240_v48  ;;  %vm165_vm2 = vcmask 1024  }
  0x29   :  { %56 = vperm.xlu0 %181, %v41_v3   ;;  %v97_v33 = vunpack.c.0.s8 %v96_v32  ;;  %v123_v47 = vadd.s32 128, %v122_v46  ;;  %v124_v50 = vcvt.s32.f32 %v122_v46 }
  0x2a   :  { %v47_v11 = vrot.slane %v42_v9, %v46_v7  ;;  %v51_v12 = vrot.slane %v42_v9, %v50_v8  ;;  %v67_v14 = vrot.slane %v62_v10, %v46_v7  ;;  %v71_v15 = vrot.slane %v62_v10, %v50_v8 }
  0x2b   :  { %v100_v35 = vsub.s32 %v97_v33, %v45_v6  ;;  %v125_v51 = vcvt.s32.f32 %v123_v47  ;;  %v129_v52 = vunpack.c.0.s8 %v128_v49 }
  0x2d   :  { %182 = vset.pattern.permute.xlu0 %v238_v4  ;;  %v138_v53 = vcombine.low %v124_v50, %v125_v51  ;;  %v132_v54 = vsub.s32 %v129_v52, %v45_v6 }
  0x2e   :  { %75 = vperm.xlu0 %182, %v41_v3  }
  0x2f   :  { %v145_v55 = vrot.slane %v138_v53, %v100_v35 }
  0xa8   :  { %v57_v13 = vpop.permute.xlu0 %56 }
  0xa9   :  { %v59_v16 = vsub.f32 %v47_v11, %v57_v13  ;;  %v60_v17 = vsub.f32 %v51_v12, %v57_v13 }
  0xab   :  { %v80_v21 = vmul.f32 %v59_v16, %v59_v16  ;;  %v81_v22 = vmul.f32 %v60_v17, %v60_v17 }
  0xad   :  { %v76_v18 = vpop.permute.xlu0 %75 }
  0xae   :  { %v78_v19 = vsub.f32 %v67_v14, %v76_v18  ;;  %v79_v20 = vsub.f32 %v71_v15, %v76_v18 }
  0xb0   :  { %v82_v23 = vmul.f32 %v78_v19, %v78_v19  ;;  %v83_v24 = vmul.f32 %v79_v20, %v79_v20 }
  0xb2   :  { %v84_v25 = vadd.f32 %v82_v23, %v80_v21  ;;  %v85_v26 = vadd.f32 %v83_v24, %v81_v22 }
  0xb4   :  { %v86_v27 = vsub.f32 0.0, %v84_v25  ;;  %v87_v28 = vsub.f32 0.0, %v85_v26 }
  0xb6   :  { %v88_v29 = vmul.f32 1.442695, %v86_v27  ;;  %v90_v30 = vmul.f32 1.442695, %v87_v28 }
  0xb8   :  { %183 = vpow2.f32 %v88_v29 }
  0xb9   :  { %185 = vpow2.f32 %v90_v30 }
  0xc2   :  { %v184_v34 = vpop.eup %183 }
  0xc3   :  { %v186_v36 = vpop.eup %185 }
  0xc4   :  { %v94_v37 = vcombine.low %v184_v34, %v186_v36 }
  0xc6   :  { %v101_v39 = vrot.slane %v94_v37, %v100_v35 }
  0xc8   :  { %v103_v40 = vmul.f32 %v101_v39, %v38_v38 }
  0xca   :  { %v111_v41 = vrot.slane %v103_v40, %v100_v35 }
  0xcc   :  { %v112_v42 = vcombine.high %v111_v41, %v111_v41  ;;  %v116_v43 = vsel %vm115_vm0, %v111_v41, -inf }
  0xce   :  { %v117_v44 = vsel %vm115_vm0, %v112_v42, -inf }
  0xcf   :  { %v118_v45 = vmax.f32 %v116_v43, %v117_v44 }
  0xd1   :  { %119 = vmax.xlane.f32.xlu1 %v118_v45 }
 0x15e   :  { %v120_v56 = vpop.xlane.xlu1 %119 }
 0x15f   :  { %v133_v57 = vrot.slane %v120_v56, %v132_v54 }
 0x161   :  { %vm135_vm1 = vcmp.eq.f32.partialorder %v103_v40, %v133_v57 }
 0x162   :  { %v147_v58 = vsel %vm135_vm1, %v145_v55, 256.0 }
 0x163   :  { %v155_v59 = vrot.slane %v147_v58, %v100_v35 }
 0x165   :  { %v156_v60 = vcombine.high %v155_v59, %v155_v59  ;;  %v159_v61 = vsel %vm115_vm0, %v155_v59, inf }
 0x167   :  { %v160_v62 = vsel %vm115_vm0, %v156_v60, inf }
 0x168   :  { %v161_v63 = vmin.f32 %v159_v61, %v160_v62 }
 0x16a   :  { %162 = vmin.xlane.f32.xlu1 %v161_v63 }
 0x1f7   :  { %v163_v0 = vpop.xlane.xlu1 %162 }
 0x1f8   :  { %v173_v1 = vtrunc.f32 %v163_v0 }
 0x1fa   :  { %v174_v2 = vcvt.f32.s32 %v173_v1 }
 0x1fc   :  { %166 = vst.msk [vmem:[%s298_s3] sm:$0x3] %vm165_vm2, %v174_v2 }
 0x1fd   :  { %171 = vsyncpa [#allocation3], 1 }
 0x1fe   :  { %172 = vsyncpa [#allocation5], 1 }

</bundles_post_ra>
